<compile_context>
chip_gen: v7x
topology: tpu7x:2x2x1
jax: 0.10.0
libtpu: 0.0.40
codegen_flags: <defaults>
</compile_context>

<pallas_src>
import jax
import jax.numpy as jnp
from jax.experimental import pallas as pl
from jax.experimental.pallas import tpu as pltpu


def _round_up(x, m):
    return (x + m - 1) // m * m


def mlp_kernel(x_ref, w1_ref, b1_ref, w2_ref, b2_ref, o_ref):
    # x streams in as f32; cast to bf16 on the VPU (free slot under DMA/MXU).
    xb = x_ref[...].astype(jnp.bfloat16)                                   # [T, F]
    # Linear(F -> H) with BatchNorm1d (eval) pre-folded; f32 accumulation.
    h = jnp.dot(xb, w1_ref[...], preferred_element_type=jnp.float32)      # [T, H]
    h = h + b1_ref[...]
    # Dropout(0.05) / Dropout(0.35) are identity in eval mode.
    # Sigmoid via EUP exp + EUP approximate reciprocal (no f32 VALU divide).
    # TODO(synk): optional bf16 epilogue for v6e/v7x if EUP ever saturates.
    h = pl.reciprocal(1.0 + jnp.exp(-h), approx=True)
    # Linear(H -> 1): VPU multiply + lane reduce. Free leading-dim reshape
    # makes the output slab lane-dense ([T//128, 128] instead of [T, 1]).
    t, hid = h.shape
    h3 = h.reshape(t // 128, 128, hid)
    out = jnp.sum(h3 * w2_ref[...], axis=-1) + b2_ref[...]                # [T//128, 128]
    o_ref[...] = out.astype(o_ref.dtype)


def mlp_forward(x, bn_gamma, bn_beta, bn_mean, bn_var, w1, b1, w2, b2,
                eps=1e-5, tile_n=8192):
    """x: [N, F] float32; w1: [F, H], w2: [H, 1] (transposed vs. PyTorch).
    Returns [N, 1] float32."""
    n, f = x.shape
    hidden = w1.shape[1]

    # ---- wrapper-side parameter glue (not the hot path) --------------------
    # Fold BatchNorm1d (eval) into the first Linear:
    #   (x * scale + shift) @ w1 + b1 == x @ (scale[:,None] * w1) + (shift @ w1 + b1)
    inv_std = 1.0 / jnp.sqrt(bn_var + eps)
    scale = bn_gamma * inv_std
    shift = bn_beta - bn_mean * scale
    w1_bf16 = (scale[:, None] * w1).astype(jnp.bfloat16)     # tiny; MXU operand
    b1_row = (shift @ w1 + b1).reshape(1, hidden).astype(jnp.float32)
    w2_row = w2.reshape(1, hidden).astype(jnp.float32)
    b2_11 = b2.reshape(1, 1).astype(jnp.float32)

    x = x.astype(jnp.float32)   # no-op if already f32; kernel casts to bf16

    # ---- batch padding / tiling ---------------------------------------------
    # Pad only to a multiple of 128 (required for the lane-dense output), not
    # to a full tile; skip entirely when already aligned.
    n_pad = _round_up(n, 128)
    if n_pad != n:
        x = jnp.pad(x, ((0, n_pad - n), (0, 0)))

    # Multi-MiB tile to amortize per-step overhead, capped so that v7x's two
    # TensorCores both get work when there is enough batch. Tiles are kept a
    # multiple of 1024 whenever partial trailing blocks can occur so that
    # block shapes stay (8,128)-legal.
    tile_n = max(1024, _round_up(tile_n, 1024))
    if n_pad <= tile_n:
        if n_pad >= 2048:
            tile = _round_up(pl.cdiv(n_pad, 2), 1024)        # >= 2 grid steps
        else:
            tile = n_pad                                     # single full block
    else:
        tile = tile_n
    grid = (pl.cdiv(n_pad, tile),)
    out_rows = n_pad // 128
    tb = tile // 128

    cost = pl.CostEstimate(
        flops=2 * n_pad * f * hidden + 4 * n_pad * hidden,
        transcendentals=2 * n_pad * hidden,
        bytes_accessed=(n_pad * f * 4            # x read as f32
                        + f * hidden * 2         # w1 bf16
                        + hidden * 4 + hidden * 4 + 4
                        + n_pad * 4),            # lane-dense output
    )

    out = pl.pallas_call(
        mlp_kernel,
        out_shape=jax.ShapeDtypeStruct((out_rows, 128), jnp.float32),
        grid=grid,
        in_specs=[
            pl.BlockSpec((tile, f), lambda i: (i, 0)),       # x tile (pipelined, f32)
            pl.BlockSpec((f, hidden), lambda i: (0, 0)),     # w1 bf16 (VMEM-resident)
            pl.BlockSpec((1, hidden), lambda i: (0, 0)),     # b1 (BN-folded)
            pl.BlockSpec((1, hidden), lambda i: (0, 0)),     # w2 as a row
            pl.BlockSpec((1, 1), lambda i: (0, 0)),          # b2
        ],
        out_specs=pl.BlockSpec((tb, 128), lambda i: (i, 0)),
        compiler_params=pltpu.CompilerParams(
            # Batch tiles are independent -> shard across v7x's 2 TCs.
            dimension_semantics=("parallel",),
            # ~6 MiB actually needed at tile=8192 (2x2 MiB x buffers + 1 MiB h);
            # 32 MiB leaves ample headroom and stays under v7x's 64 MiB per TC.
            vmem_limit_bytes=32 * 1024 * 1024,
        ),
        cost_estimate=cost,
    )(x, w1_bf16, b1_row, w2_row, b2_11)

    # Lane-dense slab [(n_pad//128), 128] flattens row-major back to batch order.
    return out.reshape(n_pad, 1)[:n]


def reference_forward(x, bn_gamma, bn_beta, bn_mean, bn_var, w1, b1, w2, b2, eps=1e-5):
    xn = (x - bn_mean) / jnp.sqrt(bn_var + eps) * bn_gamma + bn_beta
    h = jax.nn.sigmoid(xn @ w1 + b1)
    return h @ w2 + b2


if __name__ == "__main__":
    key = jax.random.PRNGKey(0)
    N, F, H = 10, 64, 32  # batch (exercises pad path), bcl_feat_dim, hidden_dim

    ks = jax.random.split(key, 8)
    x = jax.random.normal(ks[0], (N, F), dtype=jnp.float32)

    # Deterministic synthetic parameters (shapes from module __init__).
    bn_gamma = 1.0 + 0.1 * jax.random.normal(ks[1], (F,), dtype=jnp.float32)
    bn_beta = 0.1 * jax.random.normal(ks[2], (F,), dtype=jnp.float32)
    bn_mean = 0.05 * jax.random.normal(ks[3], (F,), dtype=jnp.float32)
    bn_var = jnp.abs(1.0 + 0.1 * jax.random.normal(ks[4], (F,), dtype=jnp.float32))

    w1 = jax.random.normal(ks[5], (F, H), dtype=jnp.float32) / jnp.sqrt(F)
    b1 = 0.01 * jax.random.normal(ks[6], (H,), dtype=jnp.float32)
    w2 = jax.random.normal(ks[7], (H, 1), dtype=jnp.float32) / jnp.sqrt(H)
    b2 = jnp.zeros((1,), dtype=jnp.float32)

    out = mlp_forward(x, bn_gamma, bn_beta, bn_mean, bn_var, w1, b1, w2, b2)
    out = jax.block_until_ready(out)

    ref = reference_forward(x, bn_gamma, bn_beta, bn_mean, bn_var, w1, b1, w2, b2)
    assert out.shape == (N, 1)
    # bf16 MXU operands + EUP approximate reciprocal -> compare with a modest
    # tolerance against the full-f32 reference.
    max_diff = jnp.max(jnp.abs(out - ref))
    assert jnp.allclose(out, ref, atol=5e-2, rtol=5e-2), (
        f"mismatch vs. reference, max |diff| = {max_diff}")

    print("KERNEL_OK")
</pallas_src>

<mosaic_0001>
module attributes {stable_mosaic.version = 11 : i64} {
  func.func @mlp_kernel(%arg0: i32, %arg1: memref<128x64xf32, #tpu.memory_space<vmem>>, %arg2: memref<64x32xbf16, #tpu.memory_space<vmem>>, %arg3: memref<1x32xf32, #tpu.memory_space<vmem>>, %arg4: memref<1x32xf32, #tpu.memory_space<vmem>>, %arg5: memref<1x1xf32, #tpu.memory_space<vmem>>, %arg6: memref<1x128xf32, #tpu.memory_space<vmem>>) attributes {dimension_semantics = [#tpu.dimension_semantics<parallel>], iteration_bounds = array<i64: 1>, scalar_prefetch = 0 : i64, scratch_operands = 0 : i64, tpu.core_type = #tpu.core_type<tc>, window_params = [{transform_indices = @transform_0, window_bounds = array<i64: 128, 64>}, {pipeline_mode = #tpu.pipeline_mode<synchronous>, transform_indices = @transform_1, window_bounds = array<i64: 64, 32>}, {pipeline_mode = #tpu.pipeline_mode<synchronous>, transform_indices = @transform_2, window_bounds = array<i64: 1, 32>}, {pipeline_mode = #tpu.pipeline_mode<synchronous>, transform_indices = @transform_3, window_bounds = array<i64: 1, 32>}, {pipeline_mode = #tpu.pipeline_mode<synchronous>, transform_indices = @transform_4, window_bounds = array<i64: 1, 1>}, {transform_indices = @transform_5, window_bounds = array<i64: 1, 128>}]} {
    %c0 = arith.constant 0 : index
    %c0_0 = arith.constant 0 : index
    %0 = vector.load %arg1[%c0, %c0_0] : memref<128x64xf32, #tpu.memory_space<vmem>>, vector<128x64xf32>
    %1 = arith.truncf %0 : vector<128x64xf32> to vector<128x64xbf16>
    %c0_1 = arith.constant 0 : index
    %c0_2 = arith.constant 0 : index
    %2 = vector.load %arg2[%c0_1, %c0_2] : memref<64x32xbf16, #tpu.memory_space<vmem>>, vector<64x32xbf16>
    %cst = arith.constant dense<0.000000e+00> : vector<128x32xf32>
    %3 = tpu.matmul %1, %2, %cst {dimension_numbers = #tpu.dot_dimension_numbers<[1], [0], [0], [1], [0, 0, 1, 1], [], []>} : vector<128x64xbf16>, vector<64x32xbf16>, vector<128x32xf32> -> vector<128x32xf32>
    %c0_3 = arith.constant 0 : index
    %c0_4 = arith.constant 0 : index
    %4 = vector.load %arg3[%c0_3, %c0_4] : memref<1x32xf32, #tpu.memory_space<vmem>>, vector<1x32xf32>
    %5 = vector.broadcast %4 : vector<1x32xf32> to vector<128x32xf32>
    %6 = arith.addf %3, %5 : vector<128x32xf32>
    %cst_5 = arith.constant 0.000000e+00 : f32
    %7 = vector.broadcast %cst_5 : f32 to vector<128x32xf32>
    %8 = arith.subf %7, %6 : vector<128x32xf32>
    %9 = math.exp %8 : vector<128x32xf32>
    %cst_6 = arith.constant 1.000000e+00 : f32
    %10 = vector.broadcast %cst_6 : f32 to vector<128x32xf32>
    %11 = arith.addf %10, %9 : vector<128x32xf32>
    %12 = tpu.reciprocal %11 {approx = true} : vector<128x32xf32> -> vector<128x32xf32>
    %13 = vector.shape_cast %12 : vector<128x32xf32> to vector<1x128x32xf32>
    %c0_7 = arith.constant 0 : index
    %c0_8 = arith.constant 0 : index
    %14 = vector.load %arg4[%c0_7, %c0_8] : memref<1x32xf32, #tpu.memory_space<vmem>>, vector<1x32xf32>
    %15 = vector.shape_cast %14 : vector<1x32xf32> to vector<1x1x32xf32>
    %16 = vector.broadcast %15 : vector<1x1x32xf32> to vector<1x128x32xf32>
    %17 = arith.mulf %13, %16 : vector<1x128x32xf32>
    %cst_9 = arith.constant dense<0.000000e+00> : vector<1x128xf32>
    %18 = vector.multi_reduction <add>, %17, %cst_9 [2] : vector<1x128x32xf32> to vector<1x128xf32>
    %c0_10 = arith.constant 0 : index
    %c0_11 = arith.constant 0 : index
    %19 = vector.load %arg5[%c0_10, %c0_11] : memref<1x1xf32, #tpu.memory_space<vmem>>, vector<1x1xf32>
    %20 = vector.broadcast %19 : vector<1x1xf32> to vector<1x128xf32>
    %21 = arith.addf %18, %20 : vector<1x128xf32>
    %c0_12 = arith.constant 0 : index
    %c0_13 = arith.constant 0 : index
    %22 = vector.load %arg6[%c0_12, %c0_13] : memref<1x128xf32, #tpu.memory_space<vmem>>, vector<1x128xf32>
    tpu.vector_store %arg6[%c0_12, %c0_13], %21 {strides = array<i32>} : memref<1x128xf32, #tpu.memory_space<vmem>>, vector<1x128xf32>,
    return
  }
  func.func @transform_0(%arg0: i32) -> (i32, i32) {
    %c0_i32 = arith.constant 0 : i32
    %c0_i32_0 = arith.constant 0 : i32
    return %arg0, %c0_i32 : i32, i32
  }
  func.func @transform_1(%arg0: i32) -> (i32, i32) {
    %c0_i32 = arith.constant 0 : i32
    %c0_i32_0 = arith.constant 0 : i32
    %c0_i32_1 = arith.constant 0 : i32
    return %c0_i32, %c0_i32_0 : i32, i32
  }
  func.func @transform_2(%arg0: i32) -> (i32, i32) {
    %c0_i32 = arith.constant 0 : i32
    %c0_i32_0 = arith.constant 0 : i32
    %c0_i32_1 = arith.constant 0 : i32
    return %c0_i32, %c0_i32_0 : i32, i32
  }
  func.func @transform_3(%arg0: i32) -> (i32, i32) {
    %c0_i32 = arith.constant 0 : i32
    %c0_i32_0 = arith.constant 0 : i32
    %c0_i32_1 = arith.constant 0 : i32
    return %c0_i32, %c0_i32_0 : i32, i32
  }
  func.func @transform_4(%arg0: i32) -> (i32, i32) {
    %c0_i32 = arith.constant 0 : i32
    %c0_i32_0 = arith.constant 0 : i32
    %c0_i32_1 = arith.constant 0 : i32
    return %c0_i32, %c0_i32_0 : i32, i32
  }
  func.func @transform_5(%arg0: i32) -> (i32, i32) {
    %c0_i32 = arith.constant 0 : i32
    %c0_i32_0 = arith.constant 0 : i32
    return %arg0, %c0_i32 : i32, i32
  }
}

</mosaic_0001>

<bundles_post_ra>
// kernel: tpu_custom_call.1
= control target key start
LH: loop header
LB: loop body
LE: loop exit
PB: predicated region body
PF: predicated region fallthrough
CT: control target
= control target key end

     0   :  { %s913_s0 = inlined_call_operand.vmem [shape: f32[128,64], index: 0, kind: input, shape index: {}]   ;;  %s914_s1 = inlined_call_operand.vmem [shape: bf16[64,32], index: 1, kind: input, shape index: {}]   ;;  %s915_s2 = inlined_call_operand.vmem [shape: f32[1,32], index: 2, kind: input, shape index: {}]   ;;  %s916_s3 = inlined_call_operand.vmem [shape: f32[1,32], index: 3, kind: input, shape index: {}]   ;;  %s917_s4 = inlined_call_operand.<no memory space> [shape: f32[1,1], index: 4, kind: input, shape index: {}]   ;;  %s918_s5 = inlined_call_operand.hbm [shape: f32[1,128], index: 5, kind: output, shape index: {}]  }
   0x1   :  { %v10_v0 = vstv %s917_s4 }
   0x2   :  { %11 = vst [vmem:[#allocation2] sm:$0x1] %v10_v0 }
   0x3   :  { %v592_v1 = vld [vmem:[%s914_s1] sm:$0xff]   ;;  %v593_v2 = vld [vmem:[%s914_s1 + $0x8] sm:$0xff]   ;;  %v594_v3 = vld [vmem:[%s914_s1 + $0x10] sm:$0xff]   ;;  %vm87_vm0 = vcmask 523264  }
   0x4   :  { %556 = vmatprep.subr.bf16.mxu0 %v592_v1  ;;  %580 = vmatprep.subr.bf16.mxu1 %v592_v1  ;;  %v24_v4 = vld [vmem:[%s913_s0] sm:$0xff]  ;;  %v25_v5 = vld [vmem:[%s913_s0 + $0x8] sm:$0xff]  ;;  %v595_v9 = vld [vmem:[%s914_s1 + $0x18] sm:$0xff]  }
   0x5   :  { %557 = vmatpush3.bf16.msra.mxu0 %v592_v1  ;;  %584 = vmatpush3.bf16.msra.mxu1 %v592_v1  ;;  %v40_v6 = vpack.c.bf16 %v25_v5, %v24_v4  ;;  %v32_v7 = vld [vmem:[%s913_s0 + $0x40] sm:$0xff]  ;;  %v33_v8 = vld [vmem:[%s913_s0 + $0x48] sm:$0xff] }
   0x6   :  { %558 = vmatprep.subr.bf16.mxu0 %v593_v2  ;;  %581 = vmatprep.subr.bf16.mxu1 %v593_v2  ;;  %v44_v10 = vpack.c.bf16 %v33_v8, %v32_v7 }
   0x7   :  { %564 = vmatprep.mubr.msk.bf16.mxu0 %vm87_vm0, %v40_v6 }
   0x9   :  { %559 = vmatpush3.bf16.msra.mxu0 %v593_v2  ;;  %585 = vmatpush3.bf16.msra.mxu1 %v593_v2 }
   0xa   :  { %560 = vmatprep.subr.bf16.mxu0 %v594_v3  ;;  %582 = vmatprep.subr.bf16.mxu1 %v594_v3 }
   0xb   :  { %12 = vsyncpa [#allocation4], 0  ;;  %572 = vmatprep.mubr.msk.bf16.mxu1 %vm87_vm0, %v44_v10  ;;  %v26_v11 = vld [vmem:[%s913_s0 + $0x10] sm:$0xff]  ;;  %v27_v12 = vld [vmem:[%s913_s0 + $0x18] sm:$0xff]  ;;  %v684_v29 = vmov 0   ;;  %vm312_vm1 = vcmask 261120  }
   0xc   :  { %v28_v13 = vld [vmem:[%s913_s0 + $0x20] sm:$0xff]  ;;  %v29_v14 = vld [vmem:[%s913_s0 + $0x28] sm:$0xff]  ;;  %v34_v15 = vld [vmem:[%s913_s0 + $0x50] sm:$0xff]  ;;  %v41_v19 = vpack.c.bf16 %v27_v12, %v26_v11  ;;  %590 = vset.pattern.permute.xlu1 %v684_v29  ;;  %591 = vset.pattern.permute.xlu0 %v684_v29  ;;  %vm414_vm2 = vcmask 130112   ;;  %vm421_vm3 = vcmask 195712   ;;  %vm428_vm4 = vcmask 261312  }
   0xd   :  { %561 = vmatpush3.bf16.msra.mxu0 %v594_v3  ;;  %586 = vmatpush3.bf16.msra.mxu1 %v594_v3  ;;  %v35_v16 = vld [vmem:[%s913_s0 + $0x58] sm:$0xff]  ;;  %v36_v17 = vld [vmem:[%s913_s0 + $0x60] sm:$0xff]  ;;  %v37_v18 = vld [vmem:[%s913_s0 + $0x68] sm:$0xff]  ;;  %v42_v20 = vpack.c.bf16 %v29_v14, %v28_v13  ;;  %vm435_vm5 = vcmask 326912   ;;  %vm442_vm6 = vcmask 392512   ;;  %vm449_vm7 = vcmask 458112  }
   0xe   :  { %562 = vmatprep.subr.bf16.mxu0 %v595_v9  ;;  %583 = vmatprep.subr.bf16.mxu1 %v595_v9  ;;  %v45_v21 = vpack.c.bf16 %v35_v16, %v34_v15  ;;  %v46_v22 = vpack.c.bf16 %v37_v18, %v36_v17  ;;  %v30_v23 = vld [vmem:[%s913_s0 + $0x30] sm:$0xff]  ;;  %v31_v24 = vld [vmem:[%s913_s0 + $0x38] sm:$0xff]  ;;  %v790_v30 = vld [vmem:[%s915_s2] ss:$0 sm:$0xff]  ;;  %vm456_vm8 = vcmask 523712   ;;  %vm463_vm9 = vcmask 589312  }
   0xf   :  { %v38_v25 = vld [vmem:[%s913_s0 + $0x70] sm:$0xff]  ;;  %v39_v26 = vld [vmem:[%s913_s0 + $0x78] sm:$0xff]  ;;  %v43_v27 = vpack.c.bf16 %v31_v24, %v30_v23  ;;  %vm470_vm10 = vcmask 654912   ;;  %vm477_vm11 = vcmask 720512   ;;  %vm484_vm12 = vcmask 786112  }
  0x10   :  { %v47_v28 = vpack.c.bf16 %v39_v26, %v38_v25  ;;  %vm491_vm13 = vcmask 851712   ;;  %vm498_vm14 = vcmask 917312   ;;  %vm505_vm15 = vcmask 982912  }
  0x11   :  { %563 = vmatpush3.bf16.msra.mxu0 %v595_v9  ;;  %587 = vmatpush3.bf16.msra.mxu1 %v595_v9 }
  0x14   :  { %565 = vmatmul.mubr.msk.bf16.vlgmr.msra.gmra.mrb[0].mxu0 %vm87_vm0, %v41_v19  ;;  %573 = vmatmul.mubr.msk.bf16.vlgmr.msra.gmra.mrb[0].mxu1 %vm87_vm0, %v45_v21 }
  0x15   :  { %568 = vmatprep.mubr.msk.bf16.mxu0 %vm87_vm0, %v42_v20  ;;  %576 = vmatprep.mubr.msk.bf16.mxu1 %vm87_vm0, %v46_v22 }
  0x1c   :  { %569 = vmatmul.mubr.msk.bf16.gmra.mrb[4].mxu0 %vm87_vm0, %v43_v27  ;;  %577 = vmatmul.mubr.msk.bf16.gmra.mrb[4].mxu1 %vm87_vm0, %v47_v28  ;;  %vm512_vm0 = vcmask 1048512  }
  0xe7   :  { %v566_v31 = vpop.f32.mrb[0].mxu0  ;;  %v574_v34 = vpop.f32.mrb[0].mxu1 }
  0xe8   :  { %v155_v32 = vadd.f32 %v566_v31, %v790_v30  ;;  %v146_v33 = vpop.f32.mrb[1].mxu0  ;;  %v178_v37 = vpop.f32.mrb[1].mxu1  ;;  %v187_v11 = vadd.f32 %v574_v34, %v790_v30 }
  0xe9   :  { %v147_v35 = vadd.f32 %v790_v30, %v146_v33  ;;  %v567_v36 = vpop.f32.mrb[2].mxu0  ;;  %v179_v41 = vadd.f32 %v790_v30, %v178_v37  ;;  %v575_v42 = vpop.f32.mrb[2].mxu1 }
  0xea   :  { %v211_v38 = vsub.f32 0.0, %v155_v32  ;;  %v158_v39 = vadd.f32 %v567_v36, %v790_v30  ;;  %v149_v40 = vpop.f32.mrb[3].mxu0  ;;  %v190_v45 = vadd.f32 %v575_v42, %v790_v30  ;;  %v181_v46 = vpop.f32.mrb[3].mxu1  ;;  %v219_v18 = vsub.f32 0.0, %v187_v11 }
  0xeb   :  { %v209_v43 = vsub.f32 0.0, %v147_v35  ;;  %v150_v44 = vadd.f32 %v790_v30, %v149_v40  ;;  %v217_v51 = vsub.f32 0.0, %v179_v41  ;;  %v182_v54 = vadd.f32 %v790_v30, %v181_v46 }
  0xec   :  { %v229_v47 = vmul.f32 1.442695, %v211_v38  ;;  %v212_v48 = vsub.f32 0.0, %v158_v39  ;;  %v220_v52 = vsub.f32 0.0, %v190_v45  ;;  %v245_v26 = vmul.f32 1.442695, %v219_v18 }
  0xed   :  { %v225_v49 = vmul.f32 1.442695, %v209_v43  ;;  %v210_v50 = vsub.f32 0.0, %v150_v44  ;;  %v241_v63 = vmul.f32 1.442695, %v217_v51  ;;  %v218_v4 = vsub.f32 0.0, %v182_v54 }
  0xee   :  { %596 = vpow2.f32 %v229_v47  ;;  %v231_v53 = vmul.f32 1.442695, %v212_v48  ;;  %v247_v59 = vmul.f32 1.442695, %v220_v52  ;;  %v810_v43 = vld [vmem:[%s916_s3] ss:$0 sm:$0xff] }
  0xef   :  { %598 = vpow2.f32 %v225_v49  ;;  %v227_v55 = vmul.f32 1.442695, %v210_v50  ;;  %v570_v56 = vpop.f32.mrb[4].mxu0  ;;  %v578_v60 = vpop.f32.mrb[4].mxu1  ;;  %v243_v15 = vmul.f32 1.442695, %v218_v4 }
  0xf0   :  { %600 = vpow2.f32 %v231_v53  ;;  %v171_v57 = vadd.f32 %v570_v56, %v790_v30  ;;  %v162_v58 = vpop.f32.mrb[5].mxu0  ;;  %v194_v0 = vpop.f32.mrb[5].mxu1  ;;  %v203_v28 = vadd.f32 %v578_v60, %v790_v30  ;;  %s685_s3 = smov [#allocation3]  }
  0xf1   :  { %602 = vpow2.f32 %v227_v55  ;;  %v163_v61 = vadd.f32 %v790_v30, %v162_v58  ;;  %v571_v62 = vpop.f32.mrb[6].mxu0  ;;  %v579_v5 = vpop.f32.mrb[6].mxu1  ;;  %v195_v27 = vadd.f32 %v790_v30, %v194_v0  ;;  %s522_s9 = sshll.u32 %s685_s3, 4  ;;  %s523_s9 = int_to_ptr.vmem [resolvable:$true] %s522_s9 }
  0xf2   :  { %v215_v1 = vsub.f32 0.0, %v171_v57  ;;  %v174_v2 = vadd.f32 %v571_v62, %v790_v30  ;;  %v165_v3 = vpop.f32.mrb[7].mxu0  ;;  %v197_v8 = vpop.f32.mrb[7].mxu1  ;;  %604 = vpow2.f32 %v247_v59  ;;  %v223_v37 = vsub.f32 0.0, %v203_v28  ;;  %s660_s10 = scalar_lea.vmem %s523_s9, 16  ;;  %s664_s11 = scalar_lea.vmem %s523_s9, 32 }
  0xf3   :  { %v213_v6 = vsub.f32 0.0, %v163_v61  ;;  %v166_v7 = vadd.f32 %v790_v30, %v165_v3  ;;  %606 = vpow2.f32 %v241_v63  ;;  %v221_v34 = vsub.f32 0.0, %v195_v27  ;;  %p661_p0 = scmp.ne.s32.totalorder %s523_s9, %s660_s10  ;;  %p665_p1 = scmp.lt.s32.totalorder %s523_s9, %s523_s9 }
  0xf4   :  { %v237_v9 = vmul.f32 1.442695, %v215_v1  ;;  %v216_v10 = vsub.f32 0.0, %v174_v2  ;;  %v198_v38 = vadd.f32 %v790_v30, %v197_v8  ;;  %v206_v47 = vadd.f32 %v579_v5, %v790_v30  ;;  %p666_p2 = scmp.lt.s32.totalorder %s664_s11, %s660_s10 }
  0xf5   :  { %v233_v12 = vmul.f32 1.442695, %v213_v6  ;;  %v214_v13 = vsub.f32 0.0, %v166_v7  ;;  %v249_v46 = vmul.f32 1.442695, %v221_v34 }
  0xf6   :  { %608 = vpow2.f32 %v237_v9  ;;  %v239_v14 = vmul.f32 1.442695, %v216_v10  ;;  %v253_v49 = vmul.f32 1.442695, %v223_v37  ;;  %v222_v50 = vsub.f32 0.0, %v198_v38  ;;  %p667_p3 = por %p666_p2, %p665_p1 }
  0xf7   :  { %610 = vpow2.f32 %v233_v12  ;;  %v235_v16 = vmul.f32 1.442695, %v214_v13  ;;  %v224_v30 = vsub.f32 0.0, %v206_v47  ;;  %v361_v37 = vld [vmem:[#allocation2] sm:$0x1] }
  0xf8   :  { %v597_v17 = vpop.eup %596  ;;  %612 = vpow2.f32 %v239_v14  ;;  %v251_v61 = vmul.f32 1.442695, %v222_v50  ;;  %p668_p4 = pnand %p667_p3, %p661_p0 }
  0xf9   :  { %v599_v19 = vpop.eup %598  ;;  %v259_v20 = vadd.f32 1.0, %v597_v17  ;;  %614 = vpow2.f32 %v235_v16  ;;  %v255_v5 = vmul.f32 1.442695, %v224_v30 }
  0xfa   :  { %v601_v21 = vpop.eup %600  ;;  %v257_v22 = vadd.f32 1.0, %v599_v19  ;;  %616 = vpow2.f32 %v243_v15 }
  0xfb   :  { %v603_v23 = vpop.eup %602  ;;  %618 = vrcp.f32 %v259_v20  ;;  %v260_v24 = vadd.f32 1.0, %v601_v21 }
  0xfc   :  { %620 = vrcp.f32 %v257_v22  ;;  %v258_v25 = vadd.f32 1.0, %v603_v23  ;;  %v605_v29 = vpop.eup %604 }
  0xfd   :  { %622 = vrcp.f32 %v260_v24  ;;  %v607_v31 = vpop.eup %606  ;;  %v268_v32 = vadd.f32 1.0, %v605_v29 }
  0xfe   :  { %624 = vrcp.f32 %v258_v25  ;;  %v265_v52 = vadd.f32 1.0, %v607_v31 }
  0xff   :  { %626 = vpow2.f32 %v245_v26 }
 0x100   :  { %v609_v33 = vpop.eup %608  ;;  %628 = vrcp.f32 %v268_v32 }
 0x101   :  { %v611_v35 = vpop.eup %610  ;;  %v263_v36 = vadd.f32 1.0, %v609_v33 }
 0x102   :  { %v613_v39 = vpop.eup %612  ;;  %v261_v40 = vadd.f32 1.0, %v611_v35 }
 0x103   :  { %v615_v41 = vpop.eup %614  ;;  %630 = vrcp.f32 %v263_v36  ;;  %v264_v42 = vadd.f32 1.0, %v613_v39 }
 0x104   :  { %v617_v44 = vpop.eup %616  ;;  %632 = vrcp.f32 %v261_v40  ;;  %v262_v45 = vadd.f32 1.0, %v615_v41 }
 0x105   :  { %v619_v48 = vpop.eup %618  ;;  %v266_v63 = vadd.f32 1.0, %v617_v44 }
 0x106   :  { %v621_v51 = vpop.eup %620  ;;  %634 = vrcp.f32 %v262_v45  ;;  %v298_v53 = vmul.f32 %v619_v48, %v810_v43 }
 0x107   :  { %v623_v54 = vpop.eup %622  ;;  %636 = vrcp.f32 %v264_v42  ;;  %v296_v55 = vmul.f32 %v621_v51, %v810_v43 }
 0x108   :  { %v625_v56 = vpop.eup %624  ;;  %638 = vpow2.f32 %v249_v46  ;;  %v319_v57 = vsel %vm312_vm1, %v298_v53, 0.0  ;;  %v299_v58 = vmul.f32 %v623_v54, %v810_v43 }
 0x109   :  { %640 = vpow2.f32 %v253_v49  ;;  %320 = vadd.xlane.f32.xlu1 %v319_v57  ;;  %v313_v59 = vsel %vm312_vm1, %v296_v55, 0.0  ;;  %v297_v60 = vmul.f32 %v625_v56, %v810_v43  ;;  %v627_v62 = vpop.eup %626  ;;  %v367_v57 = vlaneseq }
 0x10a   :  { %642 = vrcp.f32 %v265_v52  ;;  %314 = vadd.xlane.f32.xlu0 %v313_v59  ;;  %v629_v0 = vpop.eup %628  ;;  %v322_v1 = vsel %vm312_vm1, %v299_v58, 0.0  ;;  %v267_v7 = vadd.f32 1.0, %v627_v62 }
 0x10b   :  { %v307_v2 = vmul.f32 %v629_v0, %v810_v43  ;;  %v316_v4 = vsel %vm312_vm1, %v297_v60, 0.0  ;;  %644 = vpow2.f32 %v251_v61  ;;  %v845_v59 = vshrl.u32 %v367_v57, 7 }
 0x10c   :  { %646 = vrcp.f32 %v266_v63  ;;  %v848_v61 = vand.u32 127, %v367_v57 }
 0x10d   :  { %v631_v3 = vpop.eup %630  ;;  %323 = vadd.xlane.f32.xlu1 %v322_v1  ;;  %v346_v9 = vsel %vm312_vm1, %v307_v2, 0.0  ;;  %648 = vpow2.f32 %v255_v5  ;;  %v369_v60 = vsub.s32 0, %v845_v59 }
 0x10e   :  { %v633_v6 = vpop.eup %632  ;;  %317 = vadd.xlane.f32.xlu0 %v316_v4  ;;  %v302_v8 = vmul.f32 %v631_v3, %v810_v43  ;;  %650 = vrcp.f32 %v267_v7  ;;  %v409_v0 = vadd.s32 4294967288, %v848_v61  ;;  %v416_v1 = vadd.s32 4294967280, %v848_v61 }
 0x10f   :  { %v300_v14 = vmul.f32 %v633_v6, %v810_v43  ;;  %v407_v5 = vsub.s32 %v848_v61, %v845_v59 }
 0x110   :  { %v635_v10 = vpop.eup %634  ;;  %v331_v11 = vsel %vm312_vm1, %v302_v8, 0.0  ;;  %v412_v6 = vsub.s32 %v409_v0, %v845_v59  ;;  %v419_v8 = vsub.s32 %v416_v1, %v845_v59 }
 0x111   :  { %v637_v12 = vpop.eup %636  ;;  %v301_v13 = vmul.f32 %v635_v10, %v810_v43  ;;  %v325_v20 = vsel %vm312_vm1, %v300_v14, 0.0  ;;  %v430_v14 = vadd.s32 4294967264, %v848_v61 }
 0x112   :  { %v639_v15 = vpop.eup %638  ;;  %332 = vadd.xlane.f32.xlu0 %v331_v11  ;;  %v303_v21 = vmul.f32 %v637_v12, %v810_v43  ;;  %v423_v11 = vadd.s32 4294967272, %v848_v61 }
 0x113   :  { %v641_v16 = vpop.eup %640  ;;  %v269_v17 = vadd.f32 1.0, %v639_v15  ;;  %v328_v18 = vsel %vm312_vm1, %v301_v13, 0.0 }
 0x114   :  { %v643_v19 = vpop.eup %642  ;;  %329 = vadd.xlane.f32.xlu1 %v328_v18  ;;  %v271_v22 = vadd.f32 1.0, %v641_v16  ;;  %v334_v26 = vsel %vm312_vm1, %v303_v21, 0.0  ;;  %v437_v18 = vadd.s32 4294967256, %v848_v61  ;;  %v433_v21 = vsub.s32 %v430_v14, %v845_v59 }
 0x115   :  { %652 = vrcp.f32 %v269_v17  ;;  %v645_v23 = vpop.eup %644  ;;  %v304_v24 = vmul.f32 %v643_v19, %v810_v43  ;;  %v426_v17 = vsub.s32 %v423_v11, %v845_v59 }
 0x116   :  { %326 = vadd.xlane.f32.xlu0 %v325_v20  ;;  %v647_v25 = vpop.eup %646  ;;  %654 = vrcp.f32 %v271_v22  ;;  %v270_v27 = vadd.f32 1.0, %v645_v23 }
 0x117   :  { %v649_v28 = vpop.eup %648  ;;  %v337_v29 = vsel %vm312_vm1, %v304_v24, 0.0  ;;  %v305_v31 = vmul.f32 %v647_v25, %v810_v43  ;;  %v444_v24 = vadd.s32 4294967248, %v848_v61 }
 0x118   :  { %v651_v32 = vpop.eup %650  ;;  %v272_v33 = vadd.f32 1.0, %v649_v28  ;;  %656 = vrcp.f32 %v270_v27  ;;  %v440_v27 = vsub.s32 %v437_v18, %v845_v59 }
 0x119   :  { %v340_v34 = vsel %vm312_vm1, %v305_v31, 0.0  ;;  %v306_v35 = vmul.f32 %v651_v32, %v810_v43 }
 0x11a   :  { %335 = vadd.xlane.f32.xlu0 %v334_v26  ;;  %658 = vrcp.f32 %v272_v33  ;;  %v447_v33 = vsub.s32 %v444_v24, %v845_v59 }
 0x11b   :  { %v343_v38 = vsel %vm312_vm1, %v306_v35, 0.0 }
 0x11e   :  { %338 = vadd.xlane.f32.xlu0 %v337_v29  ;;  %v451_v29 = vadd.s32 4294967240, %v848_v61 }
 0x11f   :  { %v653_v36 = vpop.eup %652 }
 0x120   :  { %v308_v39 = vmul.f32 %v653_v36, %v810_v43  ;;  %v655_v40 = vpop.eup %654  ;;  %v454_v36 = vsub.s32 %v451_v29, %v845_v59 }
 0x121   :  { %v310_v42 = vmul.f32 %v655_v40, %v810_v43  ;;  %v465_v40 = vadd.s32 4294967224, %v848_v61 }
 0x122   :  { %341 = vadd.xlane.f32.xlu0 %v340_v34  ;;  %v349_v41 = vsel %vm312_vm1, %v308_v39, 0.0  ;;  %v657_v44 = vpop.eup %656 }
 0x123   :  { %v355_v45 = vsel %vm312_vm1, %v310_v42, 0.0  ;;  %v309_v46 = vmul.f32 %v657_v44, %v810_v43  ;;  %v472_v42 = vadd.s32 4294967216, %v848_v61 }
 0x124   :  { %v659_v47 = vpop.eup %658 }
 0x125   :  { %364 = vperm.xlu1 %590, %v361_v37   ;;  %v352_v48 = vsel %vm312_vm1, %v309_v46, 0.0  ;;  %v311_v49 = vmul.f32 %v659_v47, %v810_v43  ;;  %v458_v37 = vadd.s32 4294967232, %v848_v61 }
 0x126   :  { %344 = vadd.xlane.f32.xlu0 %v343_v38 }
 0x127   :  { %v358_v50 = vsel %vm312_vm1, %v311_v49, 0.0  ;;  %v468_v49 = vsub.s32 %v465_v40, %v845_v59 }
 0x12a   :  { %350 = vadd.xlane.f32.xlu0 %v349_v41 }
 0x12e   :  { %356 = vadd.xlane.f32.xlu0 %v355_v45  ;;  %v461_v45 = vsub.s32 %v458_v37, %v845_v59 }
 0x132   :  { %353 = vadd.xlane.f32.xlu0 %v352_v48 }
 0x136   :  { %359 = vadd.xlane.f32.xlu0 %v358_v50 }
 0x149   :  { %347 = vadd.xlane.f32.xlu1 %v346_v9 }
 0x196   :  { %v321_v54 = vpop.xlane.xlu1 %320 }
 0x197   :  { %v315_v51 = vpop.xlane.xlu0 %314 }
 0x19a   :  { %v324_v56 = vpop.xlane.xlu1 %323 }
 0x19b   :  { %v318_v52 = vpop.xlane.xlu0 %317 }
 0x19f   :  { %v333_v53 = vpop.xlane.xlu0 %332 }
 0x1a1   :  { %v330_v58 = vpop.xlane.xlu1 %329 }
 0x1a3   :  { %v327_v55 = vpop.xlane.xlu0 %326 }
 0x1a5   :  { %v365_v43 = vpop.permute.xlu1 %364 }
 0x1a6   :  { %v850_v63 = vrot.slane %v365_v43, %v369_v60 }
 0x1a7   :  { %v336_v30 = vpop.xlane.xlu0 %335 }
 0x1a8   :  { %v371_v3 = vadd.f32 %v850_v63, %v315_v51  ;;  %v372_v4 = vadd.f32 %v850_v63, %v318_v52  ;;  %v373_v7 = vadd.f32 %v850_v63, %v321_v54  ;;  %v374_v15 = vadd.f32 %v850_v63, %v324_v56 }
 0x1a9   :  { %v375_v19 = vadd.f32 %v850_v63, %v327_v55  ;;  %v376_v25 = vadd.f32 %v850_v63, %v330_v58  ;;  %v377_v31 = vadd.f32 %v850_v63, %v333_v53  ;;  %v378_v39 = vadd.f32 %v850_v63, %v336_v30 }
 0x1aa   :  { %v408_v9 = vrot.slane %v371_v3, %v407_v5  ;;  %v413_v10 = vrot.slane %v372_v4, %v412_v6  ;;  %v420_v13 = vrot.slane %v373_v7, %v419_v8  ;;  %v427_v23 = vrot.slane %v374_v15, %v426_v17 }
 0x1ab   :  { %v339_v62 = vpop.xlane.xlu0 %338  ;;  %v434_v28 = vrot.slane %v375_v19, %v433_v21  ;;  %v441_v35 = vrot.slane %v376_v25, %v440_v27  ;;  %v448_v41 = vrot.slane %v377_v31, %v447_v33  ;;  %v455_v48 = vrot.slane %v378_v39, %v454_v36 }
 0x1ac   :  { %v415_v16 = vsel %vm414_vm2, %v413_v10, %v408_v9  ;;  %v379_v46 = vadd.f32 %v850_v63, %v339_v62  ;;  %v479_v51 = vadd.s32 4294967208, %v848_v61  ;;  %v475_v52 = vsub.s32 %v472_v42, %v845_v59 }
 0x1ad   :  { %v422_v20 = vsel %vm421_vm3, %v420_v13, %v415_v16  ;;  %v486_v54 = vadd.s32 4294967200, %v848_v61  ;;  %v493_v56 = vadd.s32 4294967192, %v848_v61  ;;  %v500_v58 = vadd.s32 4294967184, %v848_v61 }
 0x1ae   :  { %v429_v26 = vsel %vm428_vm4, %v427_v23, %v422_v20  ;;  %v462_v57 = vrot.slane %v379_v46, %v461_v45  ;;  %v507_v30 = vadd.s32 4294967176, %v848_v61  ;;  %v482_v43 = vsub.s32 %v479_v51, %v845_v59 }
 0x1af   :  { %v342_v2 = vpop.xlane.xlu0 %341  ;;  %v436_v32 = vsel %vm435_vm5, %v434_v28, %v429_v26  ;;  %v489_v1 = vsub.s32 %v486_v54, %v845_v59  ;;  %v496_v5 = vsub.s32 %v493_v56, %v845_v59  ;;  %v503_v61 = vsub.s32 %v500_v58, %v845_v59 }
 0x1b0   :  { %v443_v38 = vsel %vm442_vm6, %v441_v35, %v436_v32  ;;  %v380_v50 = vadd.f32 %v850_v63, %v342_v2  ;;  %v510_v9 = vsub.s32 %v507_v30, %v845_v59 }
 0x1b1   :  { %v450_v44 = vsel %vm449_vm7, %v448_v41, %v443_v38 }
 0x1b2   :  { %v457_v55 = vsel %vm456_vm8, %v455_v48, %v450_v44  ;;  %v469_v60 = vrot.slane %v380_v50, %v468_v49 }
 0x1b3   :  { %v345_v12 = vpop.xlane.xlu0 %344  ;;  %v464_v62 = vsel %vm463_vm9, %v462_v57, %v457_v55 }
 0x1b4   :  { %v381_v53 = vadd.f32 %v850_v63, %v345_v12  ;;  %v471_v10 = vsel %vm470_vm10, %v469_v60, %v464_v62 }
 0x1b6   :  { %v476_v0 = vrot.slane %v381_v53, %v475_v52 }
 0x1b7   :  { %v351_v22 = vpop.xlane.xlu0 %350 }
 0x1b8   :  { %v383_v2 = vadd.f32 %v850_v63, %v351_v22  ;;  %v478_v13 = vsel %vm477_vm11, %v476_v0, %v471_v10 }
 0x1ba   :  { %v490_v14 = vrot.slane %v383_v2, %v489_v1 }
 0x1bb   :  { %v357_v34 = vpop.xlane.xlu0 %356 }
 0x1bc   :  { %v385_v8 = vadd.f32 %v850_v63, %v357_v34 }
 0x1be   :  { %v504_v17 = vrot.slane %v385_v8, %v503_v61 }
 0x1bf   :  { %v354_v47 = vpop.xlane.xlu0 %353 }
 0x1c0   :  { %v384_v6 = vadd.f32 %v850_v63, %v354_v47 }
 0x1c2   :  { %v497_v15 = vrot.slane %v384_v6, %v496_v5 }
 0x1c3   :  { %v360_v3 = vpop.xlane.xlu0 %359 }
 0x1c4   :  { %v386_v11 = vadd.f32 %v850_v63, %v360_v3 }
 0x1c6   :  { %v511_v19 = vrot.slane %v386_v11, %v510_v9 }
 0x1d6   :  { %v348_v4 = vpop.xlane.xlu1 %347 }
 0x1d7   :  { %v382_v7 = vadd.f32 %v850_v63, %v348_v4 }
 0x1d9   :  { %v483_v12 = vrot.slane %v382_v7, %v482_v43 }
 0x1db   :  { %v485_v16 = vsel %vm484_vm12, %v483_v12, %v478_v13 }
 0x1dc   :  { %v492_v18 = vsel %vm491_vm13, %v490_v14, %v485_v16 }
 0x1dd   :  { %v499_v59 = vsel %vm498_vm14, %v497_v15, %v492_v18 }
 0x1de   :  { %v506_v20 = vsel %vm505_vm15, %v504_v17, %v499_v59 }
 0x1df   :  { %v513_v21 = vsel %vm512_vm0, %v511_v19, %v506_v20 }
 0x1e0   :  { %515 = vst [vmem:[#allocation3] sm:$0x1] %v513_v21 }
 0x1e1   :  { %671 = shalt.err (!%p668_p4)
}
 0x1e2   :  { %s672_s14 = scalar_lea.hbm %s918_s5, 16 }
 0x1e3   :  { %p673_p5 = scmp.ne.s32.totalorder %s918_s5, %s672_s14  ;;  %p676_p6 = scmp.lt.u32.totalorder %s672_s14, %s918_s5 }
 0x1e5   :  { %p678_p7 = pnand %p676_p6, %p673_p5 }
 0x1e7   :  { %681 = shalt.err (!%p678_p7)
}
 0x1e8   :  { %525 = dma.vmem_to_hbm [thread:$0]  %s523_s9, 16, %s918_s5, [#allocation4]  }
 0x1e9   :  { %682 = dma.done.wait [#allocation4], 16  }
 0x1ea   :  { %683 = vsyncadd [#allocation4], 4294967280 }
 0x1eb   :  { %529 = vsyncpa [#allocation4], 1 }

</bundles_post_ra>
